<compile_context>
chip_gen: v7x
topology: tpu7x:2x2x1
jax: 0.10.0
libtpu: 0.0.40
codegen_flags: <defaults>
</compile_context>

<pallas_src>
import jax
import jax.numpy as jnp
from jax.experimental import pallas as pl
from jax.experimental.pallas import tpu as pltpu

_LANE = 128
_TARGET_BLOCK_BYTES = 4 * 1024 * 1024     # per x-block target (~4 MiB)
_VMEM_LIMIT_BYTES = 48 * 1024 * 1024      # < v7x 64 MiB physical; >> v5e 16 MiB default
_SPLIT_MIN_BYTES = 1 << 20                # only force >=2 grid steps above ~1 MiB


def _sublane_for(itemsize):
    # f32 -> 8, bf16/f16 -> 16, int8/fp8 -> 32 (native packed-dtype tiling)
    return max(8, 32 // max(1, itemsize))


def _round_down(x, m):
    return (x // m) * m


def _round_up(x, m):
    return ((x + m - 1) // m) * m


def _make_kernel(negative_slope, scale):
    # Python float literals -> inlined into the jaxpr (no captured array consts).
    pos = float(scale)
    neg = float(scale) * float(negative_slope)

    def kernel(x_ref, b_ref, o_ref):
        # (tm, tn) x-block + broadcastable bias block ((tm,1) or (1,tn)), f32 compute.
        y = x_ref[...].astype(jnp.float32) + b_ref[...]
        o_ref[...] = (y * jnp.where(y >= 0, pos, neg)).astype(o_ref.dtype)

    return kernel


def _pick_blocks(rows, lanes, itemsize):
    sublane = _sublane_for(itemsize)

    # Lane (last) dim: prefer the full row (contiguous HBM DMA, effectively 1-D
    # grid, bias re-fetch avoided); otherwise a 128-multiple chunk with a masked
    # tail block -- never a huge full-extent block for non-128-multiple lanes.
    max_tn = max(_LANE, _round_down(_TARGET_BLOCK_BYTES // (sublane * itemsize), _LANE))
    if lanes <= max_tn or lanes < _LANE:
        tn = lanes                                   # full extent: always legal
    else:
        tn = min(_round_down(lanes, _LANE), max_tn)  # 128-multiple, masked tail

    # Row (second-last) dim: fill the block budget, dtype-aware sublane rounding.
    target_rows = max(1, _TARGET_BLOCK_BYTES // (itemsize * tn))
    if target_rows >= rows:
        tm = rows                                    # full extent: always legal
    else:
        tm = max(sublane, _round_down(target_rows, sublane))

    # Megacore (v7x has 2 TCs): ensure >= 2 grid steps for non-trivial problems.
    total_bytes = rows * lanes * itemsize
    if (pl.cdiv(rows, tm) * pl.cdiv(lanes, tn) == 1) and total_bytes >= _SPLIT_MIN_BYTES:
        if rows >= 2 * sublane:
            tm = _round_up(pl.cdiv(rows, 2), sublane)
        elif lanes >= 2 * _LANE:
            tn = _round_up(pl.cdiv(lanes, 2), _LANE)

    return tm, tn


def fused_leaky_relu(x, bias, negative_slope=0.2, scale=2 ** 0.5):
    """x: (N, C, *spatial), bias: (C,). Returns array of x.shape/dtype."""
    shape = x.shape
    assert x.ndim >= 2, "expected at least (N, C)"
    N, C = int(shape[0]), int(shape[1])
    assert bias.shape == (C,)

    S = 1
    for d in shape[2:]:
        S *= int(d)

    bias_f32 = bias.astype(jnp.float32)

    if S >= _LANE:
        # Layout A: one row per (n, c) slab of prod(spatial) elements.
        rows, lanes = N * C, S
        x2 = x.reshape(rows, lanes)
        b2 = jnp.broadcast_to(bias_f32[None, :], (N, C)).reshape(rows, 1)

        def bias_spec(tm, tn):
            return pl.BlockSpec((tm, 1), lambda i, j: (i, 0))
    else:
        # Layout B: lane-dense path for small/absent spatial dims (incl. 2-D inputs).
        rows, lanes = N, C * S
        x2 = x.reshape(rows, lanes)
        b2 = jnp.repeat(bias_f32, S).reshape(1, lanes)

        def bias_spec(tm, tn):
            return pl.BlockSpec((1, tn), lambda i, j: (0, j))

    itemsize = jnp.dtype(x.dtype).itemsize
    tm, tn = _pick_blocks(rows, lanes, itemsize)
    # Keep the lane axis (j) as the last / fastest grid dimension so the bias
    # block index stays constant across consecutive steps (no re-DMA).
    grid = (pl.cdiv(rows, tm), pl.cdiv(lanes, tn))

    cost = pl.CostEstimate(
        flops=4 * rows * lanes,
        transcendentals=0,
        bytes_accessed=2 * rows * lanes * itemsize + int(b2.size) * 4,
    )

    # TODO(synk): expose input_output_aliases={0: 0} when callers can donate x.
    out2 = pl.pallas_call(
        _make_kernel(negative_slope, scale),
        out_shape=jax.ShapeDtypeStruct((rows, lanes), x.dtype),
        grid=grid,
        in_specs=[
            pl.BlockSpec((tm, tn), lambda i, j: (i, j)),
            bias_spec(tm, tn),
        ],
        out_specs=pl.BlockSpec((tm, tn), lambda i, j: (i, j)),
        compiler_params=pltpu.CompilerParams(
            dimension_semantics=("parallel", "parallel"),
            vmem_limit_bytes=_VMEM_LIMIT_BYTES,
        ),
        cost_estimate=cost,
    )(x2, b2)

    return out2.reshape(shape)


class FusedLeakyReLU:
    """JAX/Pallas analogue of the PyTorch FusedLeakyReLU module."""

    def __init__(self, channel, negative_slope=0.2, scale=2 ** 0.5, bias=None):
        # nn.Parameter(torch.zeros(channel)) -> deterministic init in-script
        self.bias = jnp.zeros((channel,), jnp.float32) if bias is None else bias
        self.negative_slope = negative_slope
        self.scale = scale

    def __call__(self, x):
        return fused_leaky_relu(x, self.bias, self.negative_slope, self.scale)


def _reference(x, bias, negative_slope=0.2, scale=2 ** 0.5):
    b = bias.reshape((1, -1) + (1,) * (x.ndim - 2))
    y = x.astype(jnp.float32) + b.astype(jnp.float32)
    out = scale * jnp.where(y >= 0, y, negative_slope * y)
    return out.astype(x.dtype)


if __name__ == "__main__":
    key = jax.random.PRNGKey(0)
    kx, kb, kx2 = jax.random.split(key, 3)

    # Main case: (N, C, H, W) with spatial >= 128 -> layout A.
    N, C, H, W = 2, 4, 16, 16
    x = jax.random.normal(kx, (N, C, H, W), dtype=jnp.float32)
    bias = jax.random.normal(kb, (C,), dtype=jnp.float32)

    mod = FusedLeakyReLU(C, bias=bias)
    out = jax.block_until_ready(mod(x))
    ref = _reference(x, bias)
    assert out.shape == (N, C, H, W)
    assert jnp.allclose(out, ref, atol=1e-6, rtol=1e-6)

    # Small-spatial case: (N, C, 4, 4) -> layout B (lane-dense (N, C*S) view).
    xs = jax.random.normal(kx2, (2, 4, 4, 4), dtype=jnp.float32)
    out_s = jax.block_until_ready(fused_leaky_relu(xs, bias))
    ref_s = _reference(xs, bias)
    assert out_s.shape == xs.shape
    assert jnp.allclose(out_s, ref_s, atol=1e-6, rtol=1e-6)

    print("KERNEL_OK")
</pallas_src>

<mosaic_0001>
module attributes {stable_mosaic.version = 11 : i64} {
  func.func @kernel(%arg0: i32, %arg1: i32, %arg2: memref<8x256xf32, #tpu.memory_space<vmem>>, %arg3: memref<8x1xf32, #tpu.memory_space<vmem>>, %arg4: memref<8x256xf32, #tpu.memory_space<vmem>>) attributes {dimension_semantics = [#tpu.dimension_semantics<parallel>, #tpu.dimension_semantics<parallel>], iteration_bounds = array<i64: 1, 1>, scalar_prefetch = 0 : i64, scratch_operands = 0 : i64, tpu.core_type = #tpu.core_type<tc>, window_params = [{transform_indices = @transform_0, window_bounds = array<i64: 8, 256>}, {transform_indices = @transform_1, window_bounds = array<i64: 8, 1>}, {transform_indices = @transform_2, window_bounds = array<i64: 8, 256>}]} {
    %c0 = arith.constant 0 : index
    %c0_0 = arith.constant 0 : index
    %0 = vector.load %arg2[%c0, %c0_0] : memref<8x256xf32, #tpu.memory_space<vmem>>, vector<8x256xf32>
    %c0_1 = arith.constant 0 : index
    %c0_2 = arith.constant 0 : index
    %1 = vector.load %arg3[%c0_1, %c0_2] : memref<8x1xf32, #tpu.memory_space<vmem>>, vector<8x1xf32>
    %2 = vector.broadcast %1 : vector<8x1xf32> to vector<8x256xf32>
    %3 = arith.addf %0, %2 : vector<8x256xf32>
    %cst = arith.constant 0.000000e+00 : f32
    %4 = vector.broadcast %cst : f32 to vector<8x256xf32>
    %5 = arith.cmpf oge, %3, %4 : vector<8x256xf32>
    %cst_3 = arith.constant 1.41421354 : f32
    %cst_4 = arith.constant 0.282842726 : f32
    %6 = vector.broadcast %cst_3 : f32 to vector<8x256xf32>
    %7 = vector.broadcast %cst_4 : f32 to vector<8x256xf32>
    %8 = arith.select %5, %6, %7 : vector<8x256xi1>, vector<8x256xf32>
    %9 = arith.mulf %3, %8 : vector<8x256xf32>
    %c0_5 = arith.constant 0 : index
    %c0_6 = arith.constant 0 : index
    %10 = vector.load %arg4[%c0_5, %c0_6] : memref<8x256xf32, #tpu.memory_space<vmem>>, vector<8x256xf32>
    tpu.vector_store %arg4[%c0_5, %c0_6], %9 {strides = array<i32>} : memref<8x256xf32, #tpu.memory_space<vmem>>, vector<8x256xf32>,
    return
  }
  func.func @transform_0(%arg0: i32, %arg1: i32) -> (i32, i32) {
    %c0_i32 = arith.constant 0 : i32
    return %arg0, %arg1 : i32, i32
  }
  func.func @transform_1(%arg0: i32, %arg1: i32) -> (i32, i32) {
    %c0_i32 = arith.constant 0 : i32
    %c0_i32_0 = arith.constant 0 : i32
    return %arg0, %c0_i32 : i32, i32
  }
  func.func @transform_2(%arg0: i32, %arg1: i32) -> (i32, i32) {
    %c0_i32 = arith.constant 0 : i32
    return %arg0, %arg1 : i32, i32
  }
}

</mosaic_0001>

<bundles_post_ra>
// kernel: tpu_custom_call.1
= control target key start
LH: loop header
LB: loop body
LE: loop exit
PB: predicated region body
PF: predicated region fallthrough
CT: control target
= control target key end

     0   :  { %7 = vsyncpa [#allocation3], 0  ;;  %s156_s0 = inlined_call_operand.hbm [shape: f32[8,256], index: 0, kind: input, shape index: {}]   ;;  %s157_s1 = inlined_call_operand.vmem [shape: f32[8,1], index: 1, kind: input, shape index: {}]   ;;  %s158_s2 = inlined_call_operand.hbm [shape: f32[8,256], index: 2, kind: output, shape index: {}]  }
   0x1   :  { %8 = vsyncpa [#allocation4], 0  ;;  %s110_s9 = smov [#allocation2]   ;;  %s62_s13 = scalar_lea.hbm %s156_s0, 256 }
   0x2   :  { %s15_s10 = sshll.u32 %s110_s9, 4  ;;  %p63_p0 = scmp.ne.s32.totalorder %s156_s0, %s62_s13  ;;  %s16_s10 = int_to_ptr.vmem [resolvable:$true] %s15_s10 }
   0x3   :  { %p66_p1 = scmp.lt.u32.totalorder %s62_s13, %s156_s0 }
   0x5   :  { %p68_p2 = pnand %p66_p1, %p63_p0 }
   0x7   :  { %71 = shalt.err (!%p68_p2)
}
   0x8   :  { %s72_s18 = scalar_lea.vmem %s16_s10, 256  ;;  %p77_p4 = scmp.lt.s32.totalorder %s16_s10, %s16_s10 }
   0x9   :  { %p73_p3 = scmp.ne.s32.totalorder %s16_s10, %s72_s18  ;;  %p78_p5 = scmp.lt.s32.totalorder %s72_s18, %s72_s18 }
   0xb   :  { %p79_p6 = por %p78_p5, %p77_p4 }
   0xd   :  { %p80_p7 = pnand %p79_p6, %p73_p3 }
   0xf   :  { %83 = shalt.err (!%p80_p7)
}
  0x10   :  { %18 = dma.hbm_to_vmem [thread:$0]  %s156_s0, 256, %s16_s10, [#allocation3]  }
  0x11   :  { %106 = dma.done.wait [#allocation3], 256  }
  0x12   :  { %107 = vsyncadd [#allocation3], 4294967040  ;;  %v111_v0 = vmov 0   ;;  %v26_v1 = vld [vmem:[%s157_s1] sm:$0xff]  ;;  %v25_v3 = vld [vmem:[#allocation2 + $0x8] sm:$0xff]  ;;  %s112_s23 = smov [#allocation5]  }
  0x13   :  { %61 = vset.pattern.permute.xlu0 %v111_v0  ;;  %v24_v2 = vld [vmem:[#allocation2] sm:$0xff]  ;;  %s48_s24 = sshll.u32 %s112_s23, 4  ;;  %v113_v7 = vmov 0.28284273   ;;  %s49_s24 = int_to_ptr.vmem [resolvable:$true] %s48_s24 }
  0x14   :  { %29 = vperm.xlu0 %61, %v26_v1   ;;  %s84_s0 = scalar_lea.vmem %s49_s24, 256  ;;  %p89_p9 = scmp.lt.s32.totalorder %s49_s24, %s49_s24 }
  0x15   :  { %p85_p8 = scmp.ne.s32.totalorder %s49_s24, %s84_s0  ;;  %p90_p10 = scmp.lt.s32.totalorder %s84_s0, %s84_s0 }
  0x17   :  { %p91_p11 = por %p90_p10, %p89_p9 }
  0x19   :  { %p92_p12 = pnand %p91_p11, %p85_p8 }
  0x93   :  { %v30_v4 = vpop.permute.xlu0 %29 }
  0x94   :  { %v32_v5 = vadd.f32 %v30_v4, %v24_v2  ;;  %v33_v6 = vadd.f32 %v30_v4, %v25_v3 }
  0x96   :  { %vm34_vm0 = vcmp.ge.f32.partialorder %v32_v5, 0.0  ;;  %vm35_vm1 = vcmp.ge.f32.partialorder %v33_v6, 0.0 }
  0x97   :  { %v36_v8 = vsel %vm34_vm0, 1.4142135, %v113_v7  ;;  %v37_v9 = vsel %vm35_vm1, 1.4142135, %v113_v7 }
  0x98   :  { %v38_v10 = vmul.f32 %v36_v8, %v32_v5  ;;  %v39_v11 = vmul.f32 %v37_v9, %v33_v6 }
  0x9a   :  { %40 = vst [vmem:[#allocation5] sm:$0xff] %v38_v10  ;;  %41 = vst [vmem:[#allocation5 + $0x8] sm:$0xff] %v39_v11 }
  0x9b   :  { %95 = shalt.err (!%p92_p12)
}
  0x9c   :  { %s96_s26 = scalar_lea.hbm %s158_s2, 256 }
  0x9d   :  { %p97_p13 = scmp.ne.s32.totalorder %s158_s2, %s96_s26  ;;  %p100_p0 = scmp.lt.u32.totalorder %s96_s26, %s158_s2 }
  0x9f   :  { %p102_p1 = pnand %p100_p0, %p97_p13 }
  0xa1   :  { %105 = shalt.err (!%p102_p1)
}
  0xa2   :  { %51 = dma.vmem_to_hbm [thread:$0]  %s49_s24, 256, %s158_s2, [#allocation4]  }
  0xa3   :  { %108 = dma.done.wait [#allocation4], 256  }
  0xa4   :  { %109 = vsyncadd [#allocation4], 4294967040 }
  0xa5   :  { %55 = vsyncpa [#allocation3], 1 }
  0xa6   :  { %56 = vsyncpa [#allocation4], 1 }

</bundles_post_ra>
